<compile_context>
chip_gen: v5e
topology: v5e:2x2
jax: 0.10.0
libtpu: 0.0.40
codegen_flags: <defaults>
</compile_context>

<pallas_src>
import functools

import jax
import jax.numpy as jnp
from jax.experimental import pallas as pl
from jax.experimental.pallas import tpu as pltpu

_GRAIN = 16  # row-tile granularity (covers bf16 sublane packing; also fine for f32)


def _round_up(x, m):
    return (x + m - 1) // m * m


def _cdiv(a, b):
    return (a + b - 1) // b


def _encoder_kernel(code_ref, coords_ref,
                    wb_ref, bb_ref, wd_ref, bd_ref,
                    w2_ref, b2_ref, out_ref):
    code = code_ref[...]                         # (TM, Dc)  bf16 (or f32)
    t = coords_ref[...].astype(jnp.float32)      # (TM, 1)   f32

    # Hidden activations with MLP W1 folded into the endpoint weights:
    #   h = (code @ W_base + b_base) + t * (code @ W_diff + b_diff)
    base = jnp.dot(code, wb_ref[...],
                   preferred_element_type=jnp.float32) + bb_ref[...]   # (TM, Dh)
    diff = jnp.dot(code, wd_ref[...],
                   preferred_element_type=jnp.float32) + bd_ref[...]   # (TM, Dh)
    h = jnp.maximum(base + diff * t, 0.0)        # MLP hidden + ReLU, f32

    out = jnp.dot(h.astype(w2_ref.dtype), w2_ref[...],
                  preferred_element_type=jnp.float32) + b2_ref[...]    # (TM, Do)
    out_ref[...] = out.astype(out_ref.dtype)


@functools.partial(jax.jit, static_argnames=("tm", "use_bf16"))
def feat_curve_encoder(code, coords, params, *, tm=1024, use_bf16=True):
    """code: (Nb, Ns, dim_code) f32, coords: (Nb, Ns) f32 -> (Nb, Ns, dim_out)."""
    assert tm % _GRAIN == 0, "tm must be a multiple of 16"
    Nb, Ns, Dc = code.shape
    N = Nb * Ns

    # linear1 weight transposed to (in, out); output columns interleaved as j*2+k.
    w1t = params["linear1_w"].T.astype(jnp.float32)      # (Dc, 2*Df)
    b1 = params["linear1_b"].astype(jnp.float32)         # (2*Df,)
    w_even = w1t[:, 0::2]      # endpoint k=0  (weighted by t)
    w_odd = w1t[:, 1::2]       # endpoint k=1  (weighted by 1 - t)
    b_even = b1[0::2]
    b_odd = b1[1::2]

    mlp_w1 = params["mlp_w1"].T.astype(jnp.float32)      # (Df, Dh)
    mlp_b1 = params["mlp_b1"].astype(jnp.float32)        # (Dh,)
    mlp_w2 = params["mlp_w2"].T.astype(jnp.float32)      # (Dh, Do)
    mlp_b2 = params["mlp_b2"].astype(jnp.float32)        # (Do,)
    Dh = mlp_w1.shape[1]
    Do = mlp_w2.shape[1]

    # Fold MLP W1 through the endpoint interpolation:
    #   feat = (code@We + be)*t + (code@Wo + bo)*(1-t)
    #   h    = feat @ W1 + b1
    #        = [code@(Wo@W1) + bo@W1 + b1] + t * [code@((We-Wo)@W1) + (be-bo)@W1]
    w_base = w_odd @ mlp_w1                               # (Dc, Dh)
    w_diff = (w_even - w_odd) @ mlp_w1                    # (Dc, Dh)
    b_base = (b_odd @ mlp_w1 + mlp_b1).reshape(1, Dh)     # f32
    b_diff = ((b_even - b_odd) @ mlp_w1).reshape(1, Dh)   # f32
    b2 = mlp_b2.reshape(1, Do)                            # f32

    mm_dtype = jnp.bfloat16 if use_bf16 else jnp.float32
    code_flat = code.reshape(N, Dc).astype(mm_dtype)
    coords_flat = coords.reshape(N, 1).astype(jnp.float32)
    w_base = w_base.astype(mm_dtype)
    w_diff = w_diff.astype(mm_dtype)
    w2 = mlp_w2.astype(mm_dtype)

    # Row-tile selection: start from a large tile (amortize the ~0.35 us/step
    # overhead, fill the MXU M dimension), then rebalance across the implied
    # number of grid steps so padding is at most one GRAIN worth of rows.
    n_steps = max(1, _cdiv(N, tm))
    tm_eff = min(tm, _round_up(_cdiv(N, n_steps), _GRAIN))
    N_pad = _round_up(N, tm_eff)
    if N_pad != N:
        pad = N_pad - N
        code_flat = jnp.pad(code_flat, ((0, pad), (0, 0)))
        coords_flat = jnp.pad(coords_flat, ((0, pad), (0, 0)))

    grid = (N_pad // tm_eff,)
    full = lambda i: (0, 0)   # weights stay resident (constant block index)

    out_flat = pl.pallas_call(
        _encoder_kernel,
        out_shape=jax.ShapeDtypeStruct((N_pad, Do), jnp.float32),
        grid_spec=pltpu.PrefetchScalarGridSpec(
            num_scalar_prefetch=0,
            grid=grid,
            in_specs=[
                pl.BlockSpec((tm_eff, Dc), lambda i: (i, 0)),   # code rows (stream)
                pl.BlockSpec((tm_eff, 1), lambda i: (i, 0)),    # coords rows
                pl.BlockSpec((Dc, Dh), full),                   # W_base
                pl.BlockSpec((1, Dh), full),                    # b_base
                pl.BlockSpec((Dc, Dh), full),                   # W_diff
                pl.BlockSpec((1, Dh), full),                    # b_diff
                pl.BlockSpec((Dh, Do), full),                   # MLP W2
                pl.BlockSpec((1, Do), full),                    # MLP b2
            ],
            out_specs=pl.BlockSpec((tm_eff, Do), lambda i: (i, 0)),
        ),
        compiler_params=pltpu.CompilerParams(
            dimension_semantics=("parallel",)),
    )(code_flat, coords_flat, w_base, b_base, w_diff, b_diff, w2, b2)

    return out_flat[:N].reshape(Nb, Ns, Do)


def _reference(code, coords, params):
    """Pure-JAX f32 reference mirroring the PyTorch forward."""
    Nb, Ns, Dc = code.shape
    Df = params["linear1_w"].shape[0] // 2
    lin = code @ params["linear1_w"].T + params["linear1_b"]        # (Nb, Ns, 2*Df)
    end_feats = lin.reshape(Nb, Ns, Df, 2)
    w = jnp.stack([coords, 1.0 - coords], axis=-1)                  # (Nb, Ns, 2)
    feat = jnp.einsum("bnjk,bnk->bnj", end_feats, w)                # (Nb, Ns, Df)
    h = jnp.maximum(feat @ params["mlp_w1"].T + params["mlp_b1"], 0.0)
    return h @ params["mlp_w2"].T + params["mlp_b2"]


def _init_params(key, dim_code, dim_feat, dim_hidden, dim_out):
    ks = jax.random.split(key, 6)
    scale = 0.1
    return {
        # nn.Linear stores weight as (out_features, in_features)
        "linear1_w": scale * jax.random.normal(ks[0], (2 * dim_feat, dim_code), jnp.float32),
        "linear1_b": scale * jax.random.normal(ks[1], (2 * dim_feat,), jnp.float32),
        "mlp_w1": scale * jax.random.normal(ks[2], (dim_hidden, dim_feat), jnp.float32),
        "mlp_b1": scale * jax.random.normal(ks[3], (dim_hidden,), jnp.float32),
        "mlp_w2": scale * jax.random.normal(ks[4], (dim_out, dim_hidden), jnp.float32),
        "mlp_b2": scale * jax.random.normal(ks[5], (dim_out,), jnp.float32),
    }


if __name__ == "__main__":
    Nb, Ns = 2, 8
    dim_code, dim_feat = 32, 16
    dim_hidden, dim_out = 32, 16

    key = jax.random.PRNGKey(0)
    k_code, k_coords, k_params, k_code2, k_coords2 = jax.random.split(key, 5)
    params = _init_params(k_params, dim_code, dim_feat, dim_hidden, dim_out)

    # Small case (single grid step).
    code = jax.random.normal(k_code, (Nb, Ns, dim_code), jnp.float32)
    coords = jax.random.uniform(k_coords, (Nb, Ns), jnp.float32)
    out = jax.block_until_ready(feat_curve_encoder(code, coords, params))
    ref = _reference(code, coords, params)
    assert out.shape == (Nb, Ns, dim_out)
    assert jnp.allclose(out, ref, atol=2e-2, rtol=2e-2), "mismatch vs reference (small)"

    # Larger case exercising multi-step grid, row padding and tile rebalancing (bf16 path).
    Nb2, Ns2 = 4, 300
    code2 = jax.random.normal(k_code2, (Nb2, Ns2, dim_code), jnp.float32)
    coords2 = jax.random.uniform(k_coords2, (Nb2, Ns2), jnp.float32)
    out2 = jax.block_until_ready(feat_curve_encoder(code2, coords2, params))
    ref2 = _reference(code2, coords2, params)
    assert out2.shape == (Nb2, Ns2, dim_out)
    assert jnp.allclose(out2, ref2, atol=2e-2, rtol=2e-2), "mismatch vs reference (large)"

    print("KERNEL_OK")
</pallas_src>

<mosaic_0001>
module attributes {stable_mosaic.version = 11 : i64} {
  func.func @_encoder_kernel(%arg0: i32, %arg1: memref<16x32xbf16, #tpu.memory_space<vmem>>, %arg2: memref<16x1xf32, #tpu.memory_space<vmem>>, %arg3: memref<32x32xbf16, #tpu.memory_space<vmem>>, %arg4: memref<1x32xf32, #tpu.memory_space<vmem>>, %arg5: memref<32x32xbf16, #tpu.memory_space<vmem>>, %arg6: memref<1x32xf32, #tpu.memory_space<vmem>>, %arg7: memref<32x16xbf16, #tpu.memory_space<vmem>>, %arg8: memref<1x16xf32, #tpu.memory_space<vmem>>, %arg9: memref<16x16xf32, #tpu.memory_space<vmem>>) attributes {dimension_semantics = [#tpu.dimension_semantics<parallel>], iteration_bounds = array<i64: 1>, scalar_prefetch = 0 : i64, scratch_operands = 0 : i64, tpu.core_type = #tpu.core_type<tc>, window_params = [{transform_indices = @transform_0, window_bounds = array<i64: 16, 32>}, {transform_indices = @transform_1, window_bounds = array<i64: 16, 1>}, {pipeline_mode = #tpu.pipeline_mode<synchronous>, transform_indices = @transform_2, window_bounds = array<i64: 32, 32>}, {pipeline_mode = #tpu.pipeline_mode<synchronous>, transform_indices = @transform_3, window_bounds = array<i64: 1, 32>}, {pipeline_mode = #tpu.pipeline_mode<synchronous>, transform_indices = @transform_4, window_bounds = array<i64: 32, 32>}, {pipeline_mode = #tpu.pipeline_mode<synchronous>, transform_indices = @transform_5, window_bounds = array<i64: 1, 32>}, {pipeline_mode = #tpu.pipeline_mode<synchronous>, transform_indices = @transform_6, window_bounds = array<i64: 32, 16>}, {pipeline_mode = #tpu.pipeline_mode<synchronous>, transform_indices = @transform_7, window_bounds = array<i64: 1, 16>}, {transform_indices = @transform_8, window_bounds = array<i64: 16, 16>}]} {
    %c0 = arith.constant 0 : index
    %c0_0 = arith.constant 0 : index
    %0 = vector.load %arg1[%c0, %c0_0] : memref<16x32xbf16, #tpu.memory_space<vmem>>, vector<16x32xbf16>
    %c0_1 = arith.constant 0 : index
    %c0_2 = arith.constant 0 : index
    %1 = vector.load %arg2[%c0_1, %c0_2] : memref<16x1xf32, #tpu.memory_space<vmem>>, vector<16x1xf32>
    %c0_3 = arith.constant 0 : index
    %c0_4 = arith.constant 0 : index
    %2 = vector.load %arg3[%c0_3, %c0_4] : memref<32x32xbf16, #tpu.memory_space<vmem>>, vector<32x32xbf16>
    %cst = arith.constant dense<0.000000e+00> : vector<16x32xf32>
    %3 = tpu.matmul %0, %2, %cst {dimension_numbers = #tpu.dot_dimension_numbers<[1], [0], [0], [1], [0, 0, 1, 1], [], []>} : vector<16x32xbf16>, vector<32x32xbf16>, vector<16x32xf32> -> vector<16x32xf32>
    %c0_5 = arith.constant 0 : index
    %c0_6 = arith.constant 0 : index
    %4 = vector.load %arg4[%c0_5, %c0_6] : memref<1x32xf32, #tpu.memory_space<vmem>>, vector<1x32xf32>
    %5 = vector.broadcast %4 : vector<1x32xf32> to vector<16x32xf32>
    %6 = arith.addf %3, %5 : vector<16x32xf32>
    %c0_7 = arith.constant 0 : index
    %c0_8 = arith.constant 0 : index
    %7 = vector.load %arg5[%c0_7, %c0_8] : memref<32x32xbf16, #tpu.memory_space<vmem>>, vector<32x32xbf16>
    %cst_9 = arith.constant dense<0.000000e+00> : vector<16x32xf32>
    %8 = tpu.matmul %0, %7, %cst_9 {dimension_numbers = #tpu.dot_dimension_numbers<[1], [0], [0], [1], [0, 0, 1, 1], [], []>} : vector<16x32xbf16>, vector<32x32xbf16>, vector<16x32xf32> -> vector<16x32xf32>
    %c0_10 = arith.constant 0 : index
    %c0_11 = arith.constant 0 : index
    %9 = vector.load %arg6[%c0_10, %c0_11] : memref<1x32xf32, #tpu.memory_space<vmem>>, vector<1x32xf32>
    %10 = vector.broadcast %9 : vector<1x32xf32> to vector<16x32xf32>
    %11 = arith.addf %8, %10 : vector<16x32xf32>
    %12 = vector.broadcast %1 : vector<16x1xf32> to vector<16x32xf32>
    %13 = arith.mulf %11, %12 : vector<16x32xf32>
    %14 = arith.addf %6, %13 : vector<16x32xf32>
    %cst_12 = arith.constant 0.000000e+00 : f32
    %15 = vector.broadcast %cst_12 : f32 to vector<16x32xf32>
    %16 = arith.maximumf %14, %15 : vector<16x32xf32>
    %17 = arith.truncf %16 : vector<16x32xf32> to vector<16x32xbf16>
    %c0_13 = arith.constant 0 : index
    %c0_14 = arith.constant 0 : index
    %18 = vector.load %arg7[%c0_13, %c0_14] : memref<32x16xbf16, #tpu.memory_space<vmem>>, vector<32x16xbf16>
    %cst_15 = arith.constant dense<0.000000e+00> : vector<16x16xf32>
    %19 = tpu.matmul %17, %18, %cst_15 {dimension_numbers = #tpu.dot_dimension_numbers<[1], [0], [0], [1], [0, 0, 1, 1], [], []>} : vector<16x32xbf16>, vector<32x16xbf16>, vector<16x16xf32> -> vector<16x16xf32>
    %c0_16 = arith.constant 0 : index
    %c0_17 = arith.constant 0 : index
    %20 = vector.load %arg8[%c0_16, %c0_17] : memref<1x16xf32, #tpu.memory_space<vmem>>, vector<1x16xf32>
    %21 = vector.broadcast %20 : vector<1x16xf32> to vector<16x16xf32>
    %22 = arith.addf %19, %21 : vector<16x16xf32>
    %c0_18 = arith.constant 0 : index
    %c0_19 = arith.constant 0 : index
    %23 = vector.load %arg9[%c0_18, %c0_19] : memref<16x16xf32, #tpu.memory_space<vmem>>, vector<16x16xf32>
    tpu.vector_store %arg9[%c0_18, %c0_19], %22 {strides = array<i32>} : memref<16x16xf32, #tpu.memory_space<vmem>>, vector<16x16xf32>,
    return
  }
  func.func @transform_0(%arg0: i32) -> (i32, i32) {
    %c0_i32 = arith.constant 0 : i32
    %c0_i32_0 = arith.constant 0 : i32
    return %arg0, %c0_i32 : i32, i32
  }
  func.func @transform_1(%arg0: i32) -> (i32, i32) {
    %c0_i32 = arith.constant 0 : i32
    %c0_i32_0 = arith.constant 0 : i32
    return %arg0, %c0_i32 : i32, i32
  }
  func.func @transform_2(%arg0: i32) -> (i32, i32) {
    %c0_i32 = arith.constant 0 : i32
    %c0_i32_0 = arith.constant 0 : i32
    %c0_i32_1 = arith.constant 0 : i32
    return %c0_i32, %c0_i32_0 : i32, i32
  }
  func.func @transform_3(%arg0: i32) -> (i32, i32) {
    %c0_i32 = arith.constant 0 : i32
    %c0_i32_0 = arith.constant 0 : i32
    %c0_i32_1 = arith.constant 0 : i32
    return %c0_i32, %c0_i32_0 : i32, i32
  }
  func.func @transform_4(%arg0: i32) -> (i32, i32) {
    %c0_i32 = arith.constant 0 : i32
    %c0_i32_0 = arith.constant 0 : i32
    %c0_i32_1 = arith.constant 0 : i32
    return %c0_i32, %c0_i32_0 : i32, i32
  }
  func.func @transform_5(%arg0: i32) -> (i32, i32) {
    %c0_i32 = arith.constant 0 : i32
    %c0_i32_0 = arith.constant 0 : i32
    %c0_i32_1 = arith.constant 0 : i32
    return %c0_i32, %c0_i32_0 : i32, i32
  }
  func.func @transform_6(%arg0: i32) -> (i32, i32) {
    %c0_i32 = arith.constant 0 : i32
    %c0_i32_0 = arith.constant 0 : i32
    %c0_i32_1 = arith.constant 0 : i32
    return %c0_i32, %c0_i32_0 : i32, i32
  }
  func.func @transform_7(%arg0: i32) -> (i32, i32) {
    %c0_i32 = arith.constant 0 : i32
    %c0_i32_0 = arith.constant 0 : i32
    %c0_i32_1 = arith.constant 0 : i32
    return %c0_i32, %c0_i32_0 : i32, i32
  }
  func.func @transform_8(%arg0: i32) -> (i32, i32) {
    %c0_i32 = arith.constant 0 : i32
    %c0_i32_0 = arith.constant 0 : i32
    return %arg0, %c0_i32 : i32, i32
  }
}

</mosaic_0001>

<bundles_post_ra>
// kernel: sub.3
= control target key start
LH: loop header
LB: loop body
LE: loop exit
PB: predicated region body
PF: predicated region fallthrough
CT: control target
= control target key end

     0   :  { %s34_s0 = inlined_call_operand.vmem [shape: f32[16], index: 0, kind: input, shape index: {}]   ;;  %s35_s1 = inlined_call_operand.vmem [shape: f32[16], index: 1, kind: input, shape index: {}]   ;;  %s36_s2 = inlined_call_operand.vmem [shape: f32[16], index: 2, kind: output, shape index: {}]  }
   0x1   :  { %v3_v0 = vld [vmem:[%s34_s0] sm:$0x1] }
   0x2   :  { %v4_v1 = vld [vmem:[%s35_s1] sm:$0x1] }
   0x3   :  { %v7_v2 = vsub.f32 %v3_v0, %v4_v1 }
   0x5   :  { %9 = vst [vmem:[%s36_s2] sm:$0x1] %v7_v2 }

// kernel: feat_curve_encoder.1
= control target key start
LH: loop header
LB: loop body
LE: loop exit
PB: predicated region body
PF: predicated region fallthrough
CT: control target
= control target key end

     0   :  { %v259_v3 = vmov 0   ;;  %s350_s0 = inlined_call_operand.vmem [shape: bf16[16,32], index: 0, kind: input, shape index: {}]   ;;  %s351_s1 = inlined_call_operand.vmem [shape: f32[16,1], index: 1, kind: input, shape index: {}]   ;;  %s352_s2 = inlined_call_operand.vmem [shape: bf16[32,32], index: 2, kind: input, shape index: {}]   ;;  %s353_s3 = inlined_call_operand.vmem [shape: f32[1,32], index: 3, kind: input, shape index: {}]   ;;  %s354_s4 = inlined_call_operand.vmem [shape: bf16[32,32], index: 4, kind: input, shape index: {}]   ;;  %s355_s5 = inlined_call_operand.vmem [shape: f32[1,32], index: 5, kind: input, shape index: {}]   ;;  %s356_s6 = inlined_call_operand.vmem [shape: bf16[32,16], index: 6, kind: input, shape index: {}]   ;;  %s357_s7 = inlined_call_operand.vmem [shape: f32[1,16], index: 7, kind: input, shape index: {}]   ;;  %s358_s8 = inlined_call_operand.hbm [shape: f32[16,16], index: 8, kind: output, shape index: {}]  }
   0x1   :  { %v220_v0 = vld [vmem:[%s352_s2 + $0x8] sm:$0xff]  ;;  %v219_v2 = vld [vmem:[%s352_s2] sm:$0xff]  ;;  %229 = vset.pattern.permute.xlu0 %v259_v3 }
   0x2   :  { %v222_v1 = vld [vmem:[%s354_s4 + $0x8] sm:$0xff]  ;;  %v33_v4 = vld [vmem:[%s351_s1] sm:$0xff]  ;;  %70 = vmatpush.bf16.msra.mxu0 %v220_v0 }
   0x3   :  { %104 = vmatpush.bf16.msra.mxu1 %v222_v1  ;;  %v221_v5 = vld [vmem:[%s354_s4] sm:$0xff]  ;;  %114 = vperm.xlu0 %229, %v33_v4  }
   0x4   :  { %13 = vsyncpa [#allocation3], 0  ;;  %v218_v6 = vld [vmem:[%s350_s0] sm:$0xff]  ;;  %vm60_vm0 = vcmask 261120   ;;  %v34_v7 = vld [vmem:[%s351_s1 + $0x8] sm:$0xff]  ;;  %vm166_vm1 = vcmask 130048  }
   0x5   :  { %v224_v8 = vld [vmem:[%s356_s6 + $0x8] sm:$0xff]  ;;  %v223_v9 = vld [vmem:[%s356_s6] sm:$0xff]  ;;  %s175_s26 = sshll.u32 %s358_s8, 4  ;;  %s261_s27 = smov 128   ;;  %s176_s26 = int_to_ptr.hbm [resolvable:$true] %s175_s26 }
   0x6   :  { %71 = vmatpush.bf16.msra.mxu0 %v219_v2  ;;  %158 = vmatpush.bf16.msra.mxu2 %v224_v8  ;;  %v231_v11 = vld [vmem:[%s355_s5] ss:$0 sm:$0xff]  ;;  %s262_s28 = smov 8  }
   0x7   :  { %105 = vmatpush.bf16.msra.mxu1 %v221_v5  ;;  %v230_v14 = vld [vmem:[%s353_s3] ss:$0 sm:$0xff]  ;;  %s260_s3 = smov [#allocation2]  }
   0x8   :  { %v232_v29 = vld [vmem:[%s357_s7] ss:$0 sm:$0xff]  ;;  %s173_s23 = sshll.u32 %s260_s3, 4  ;;  %s174_s23 = int_to_ptr.vmem [resolvable:$true] %s173_s23 }
   0x9   :  { %199 = vmatmul.msk.bf16.vlgmr.msra.gmra.mxu0 %vm60_vm0, %v218_v6 }
   0xa   :  { %208 = vmatmul.msk.bf16.vlgmr.msra.gmra.mxu1 %vm60_vm0, %v218_v6  ;;  %159 = vmatpush.bf16.msra.mxu2 %v223_v9 }
   0xb   :  { %119 = vperm.xlu0 %229, %v34_v7  }
  0x75   :  { %v115_v10 = vpop.permute.xlu0 %114 }
  0x7d   :  { %v120_v21 = vpop.permute.xlu0 %119 }
  0x86   :  { %v73_v12 = vpop.f32.mrf.mxu0 }
  0x87   :  { %v107_v13 = vpop.f32.mrf.mxu1  ;;  %v74_v16 = vadd.f32 %v230_v14, %v73_v12 }
  0x88   :  { %v108_v15 = vadd.f32 %v231_v11, %v107_v13 }
  0x8a   :  { %v122_v17 = vmul.f32 %v115_v10, %v108_v15 }
  0x8c   :  { %v124_v22 = vadd.f32 %v122_v17, %v74_v16 }
  0x8e   :  { %v75_v18 = vpop.f32.mrf.mxu0  ;;  %v126_v26 = vmax.f32 %v124_v22, 0.0 }
  0x8f   :  { %v109_v19 = vpop.f32.mrf.mxu1  ;;  %v76_v23 = vadd.f32 %v230_v14, %v75_v18 }
  0x90   :  { %v110_v20 = vadd.f32 %v231_v11, %v109_v19 }
  0x92   :  { %v123_v24 = vmul.f32 %v120_v21, %v110_v20 }
  0x94   :  { %v125_v25 = vadd.f32 %v123_v24, %v76_v23 }
  0x96   :  { %v127_v27 = vmax.f32 %v125_v25, 0.0 }
  0x98   :  { %v128_v28 = vpack.c.bf16 %v127_v27, %v126_v26 }
  0x9a   :  { %217 = vmatmul.msk.bf16.vlgmr.msra.gmra.mxu2 %vm60_vm0, %v128_v28 }
 0x11d   :  { %v161_v30 = vpop.f32.mrf.mxu2 }
 0x11e   :  { %v162_v31 = vadd.f32 %v232_v29, %v161_v30 }
 0x120   :  { %167 = vst.msk [vmem:[#allocation2] sm:$0xff] %vm166_vm1, %v162_v31 }
 0x125   :  { %v163_v32 = vpop.f32.mrf.mxu2 }
 0x126   :  { %v164_v33 = vadd.f32 %v232_v29, %v163_v32 }
 0x128   :  { %168 = vst.msk [vmem:[#allocation2 + $0x8] sm:$0xff] %vm166_vm1, %v164_v33 }
 0x129   :  { %181 = dma.vmem_to_hbm [thread:$0]  %s174_s23, 256, %s176_s26, [#allocation3], %s261_s27, %s261_s27, %s262_s28  }
 0x12a   :  { %257 = dma.done.wait [#allocation3], 256  }
 0x12b   :  { %258 = vsyncadd [#allocation3], 4294967040 }
 0x12c   :  { %186 = vsyncpa [#allocation3], 1 }

</bundles_post_ra>
